<compile_context>
chip_gen: v6e
topology: v6e:2x2x1
jax: 0.10.0
libtpu: 0.0.40
codegen_flags: <defaults>
</compile_context>

<pallas_src>
import functools
import math

import jax
import jax.numpy as jnp
from jax.experimental import pallas as pl
from jax.experimental.pallas import tpu as pltpu

LANE = 128  # TPU lane width; pad feature dims to a multiple of this.


# ---------------------------------------------------------------------------
# Helpers
# ---------------------------------------------------------------------------

def _round_up(v, m):
    return ((v + m - 1) // m) * m


def _pick_tile(n):
    # Biggest MXU-friendly tile that divides the (padded) node count.
    for t in (512, 256, 128):
        if n % t == 0:
            return t
    return n  # small graph: single tile == full array dims (allowed)


def _layer_vmem_budget(n_pad, f_pad, h_pad, tile, K):
    resident = (
        2 * n_pad * f_pad * 4              # x (double-buffered resident block)
        + 2 * f_pad * h_pad * 4            # W
        + 2 * 8 * h_pad * 4                # b
        + 2 * (K + 1) * 8 * h_pad * 4      # satt
        + 2 * n_pad * h_pad * 4            # resident output block
        + 2 * n_pad * h_pad * 2            # bf16 hop ping-pong scratch
        + tile * h_pad * 4                 # per-row-tile f32 accumulator
        + 2 * tile * tile * 2              # streamed adj tiles (double buffer)
    )
    return int(min(max(resident * 5 // 4 + (4 << 20), 32 << 20), 64 << 20))


def _head_vmem_budget(tile, h_pad, o_pad):
    need = (2 * tile * h_pad * 4 + 2 * h_pad * o_pad * 4
            + 2 * 8 * o_pad * 4 + 2 * tile * o_pad * 4)
    return int(min(max(need * 2 + (4 << 20), 32 << 20), 64 << 20))


# ---------------------------------------------------------------------------
# Fused per-layer kernel: linear -> K-hop Jacobi propagation -> ReLU
# ---------------------------------------------------------------------------

def _layer_kernel(x_ref, w_ref, b_ref, satt_ref, adj_ref, o_ref,
                  cur_ref, acc_ref, *, K, tm, tk):
    # grid = (K, row_tiles, col_tiles); hop axis outermost, contraction last.
    j = pl.program_id(0)          # hop index: this step builds adj^(j+1) h
    i = pl.program_id(1)          # output-row tile of the hop matmul
    k = pl.program_id(2)          # contraction tile
    n_k = pl.num_programs(2)

    src_slot = j % 2              # slot holding adj^j h (hop 0 -> slot 0)
    dst_slot = 1 - src_slot       # slot receiving adj^(j+1) h

    row0 = pl.multiple_of(i * tm, tm)
    col0 = pl.multiple_of(k * tk, tk)

    # --- layer entry, spread over the first row tile's contraction sweep:
    # compute the h rows [col0, col0+tk) = x @ W + b right before they are
    # first consumed as hop-matmul source rows; fold hop 0 (h * satt[0]) into
    # the resident output block and stash bf16 h into the ping-pong buffer.
    @pl.when((j == 0) & (i == 0))
    def _init_block():
        h_blk = (jnp.dot(x_ref[pl.ds(col0, tk), :], w_ref[...],
                         preferred_element_type=jnp.float32) + b_ref[...])
        cur_ref[0, pl.ds(col0, tk), :] = h_blk.astype(jnp.bfloat16)
        o_ref[pl.ds(col0, tk), :] = h_blk * satt_ref[0]

    # --- hop matmul: bf16 adj tile (tm, tk) x bf16 src rows (tk, h_pad),
    # f32 accumulation into a small per-row-tile VMEM accumulator.
    part = jnp.dot(adj_ref[...], cur_ref[src_slot, pl.ds(col0, tk), :],
                   preferred_element_type=jnp.float32)

    @pl.when(k == 0)
    def _set():
        acc_ref[...] = part

    @pl.when(k > 0)
    def _add():
        acc_ref[...] += part

    # --- after the last contraction tile of this row tile: commit the hop
    # rows (bf16) for the next hop (not needed after the last hop) ...
    @pl.when((k == n_k - 1) & (j < K - 1))
    def _stash():
        cur_ref[dst_slot, pl.ds(row0, tm), :] = acc_ref[...].astype(jnp.bfloat16)

    # ... and fold the f32 hop, weighted by satt[j+1], into the resident
    # output block; apply ReLU in place on the final hop.
    @pl.when(k == n_k - 1)
    def _fold():
        hop = acc_ref[...]
        new = o_ref[pl.ds(row0, tm), :] + hop * satt_ref[j + 1]
        o_ref[pl.ds(row0, tm), :] = jnp.where(j == K - 1,
                                              jnp.maximum(new, 0.0), new)


def layer_pallas(x, w, b, satt, adj_bf16, *, K, tile, h_pad):
    """Fused (linear + K-hop propagation + relu) for one layer.

    x: (Np, Din_pad) f32, w: (Din_pad, Hp) f32, b: (1, Hp) f32,
    satt: (K+1, 1, Hp) f32, adj_bf16: (Np, Np) bf16  ->  (Np, Hp) f32
    """
    n_pad, f_pad = x.shape
    n_tiles = n_pad // tile
    grid = (K, n_tiles, n_tiles)

    return pl.pallas_call(
        functools.partial(_layer_kernel, K=K, tm=tile, tk=tile),
        out_shape=jax.ShapeDtypeStruct((n_pad, h_pad), jnp.float32),
        grid_spec=pltpu.PrefetchScalarGridSpec(
            num_scalar_prefetch=0,
            grid=grid,
            in_specs=[
                pl.BlockSpec(x.shape, lambda j, i, k: (0, 0)),        # x resident
                pl.BlockSpec(w.shape, lambda j, i, k: (0, 0)),        # W resident
                pl.BlockSpec(b.shape, lambda j, i, k: (0, 0)),        # b resident
                pl.BlockSpec(satt.shape, lambda j, i, k: (0, 0, 0)),  # satt resident
                pl.BlockSpec((tile, tile), lambda j, i, k: (i, k)),   # adj streamed
            ],
            # Resident full-size output block (constant index map): written
            # back to HBM exactly once, at the end of the grid.
            out_specs=pl.BlockSpec((n_pad, h_pad), lambda j, i, k: (0, 0)),
            scratch_shapes=[
                pltpu.VMEM((2, n_pad, h_pad), jnp.bfloat16),  # hop ping-pong (bf16)
                pltpu.VMEM((tile, h_pad), jnp.float32),       # per-tile accumulator
            ],
        ),
        # Hops / contraction are sequential, and the row axis both reads the
        # full previous-hop scratch and accumulates into the resident output
        # block, so all axes stay "arbitrary".
        compiler_params=pltpu.CompilerParams(
            dimension_semantics=("arbitrary", "arbitrary", "arbitrary"),
            vmem_limit_bytes=_layer_vmem_budget(n_pad, f_pad, h_pad, tile, K),
        ),
    )(x, w, b, satt, adj_bf16)


# ---------------------------------------------------------------------------
# Head kernel: final linear (+ masked log_softmax), tiled over node rows
# ---------------------------------------------------------------------------

def _head_kernel(x_ref, w_ref, b_ref, o_ref, *, n_valid, log_softmax):
    logits = (jnp.dot(x_ref[...], w_ref[...],
                      preferred_element_type=jnp.float32) + b_ref[...])
    col = jax.lax.broadcasted_iota(jnp.int32, logits.shape, 1)
    valid = col < n_valid
    if log_softmax:
        masked = jnp.where(valid, logits, -1e30)            # padded lanes -> -inf-ish
        m = jnp.max(masked, axis=1, keepdims=True)
        e = jnp.where(valid, jnp.exp(masked - m), 0.0)
        s = jnp.sum(e, axis=1, keepdims=True)
        out = logits - m - jnp.log(s)
    else:
        out = logits
    o_ref[...] = jnp.where(valid, out, 0.0)


def head_pallas(x, w, b, *, n_valid, log_softmax, tile):
    n_pad, h_pad = x.shape
    o_pad = w.shape[1]
    n_tiles = n_pad // tile
    return pl.pallas_call(
        functools.partial(_head_kernel, n_valid=n_valid, log_softmax=log_softmax),
        out_shape=jax.ShapeDtypeStruct((n_pad, o_pad), jnp.float32),
        grid_spec=pltpu.PrefetchScalarGridSpec(
            num_scalar_prefetch=0,
            grid=(n_tiles,),
            in_specs=[
                pl.BlockSpec((tile, h_pad), lambda r: (r, 0)),   # activations streamed
                pl.BlockSpec(w.shape, lambda r: (0, 0)),         # W resident
                pl.BlockSpec(b.shape, lambda r: (0, 0)),         # b resident
            ],
            out_specs=pl.BlockSpec((tile, o_pad), lambda r: (r, 0)),
        ),
        compiler_params=pltpu.CompilerParams(
            dimension_semantics=("parallel",),
            vmem_limit_bytes=_head_vmem_budget(tile, h_pad, o_pad),
        ),
    )(x, w, b)


# ---------------------------------------------------------------------------
# Jacobi coefficient recurrence (small (K+1,) vectors -> plain JAX glue)
# ---------------------------------------------------------------------------

def calc_expansion(prevparas, L, alphas, a=1.0, b=1.0, l=-1.0, r=1.0):
    if L == 0:
        return prevparas[0]
    if L == 1:
        coef1 = (a - b) / 2 - (a + b + 2) / 2 * (l + r) / (r - l)
        coef1 = coef1 * alphas[0]
        coef2 = (a + b + 2) / (r - l)
        coef2 = coef2 * alphas[0]
        tmpneg1 = prevparas[-1]
        tmpneg2 = jnp.zeros_like(tmpneg1).at[1:].set(tmpneg1[:-1])
        return coef1 * tmpneg1 + coef2 * tmpneg2
    coef_l = 2 * L * (L + a + b) * (2 * L - 2 + a + b)
    coef_lm1_1 = (2 * L + a + b - 1) * (2 * L + a + b) * (2 * L + a + b - 2)
    coef_lm1_2 = (2 * L + a + b - 1) * (a ** 2 - b ** 2)
    coef_lm2 = 2 * (L - 1 + a) * (L - 1 + b) * (2 * L + a + b)
    tmp1 = alphas[L - 1] * (coef_lm1_1 / coef_l)
    tmp2 = alphas[L - 1] * (coef_lm1_2 / coef_l)
    tmp3 = alphas[L - 1] * alphas[L - 2] * (coef_lm2 / coef_l)
    tmp1_2 = tmp1 * (2 / (r - l))
    tmp2_2 = tmp1 * ((r + l) / (r - l)) + tmp2
    tmpneg1 = prevparas[-1]
    tmpneg2 = jnp.zeros_like(tmpneg1).at[1:].set(tmpneg1[:-1])
    tmpneg3 = prevparas[-2]
    nx = tmp1_2 * tmpneg2 - tmp2_2 * tmpneg1
    nx = nx - tmp3 * tmpneg3
    return nx


def _sum_att_for_layer(att_i, alphas, K, paraA, paraB):
    """att_i: (HID, K+1) -> per-channel hop coefficients sum_att (HID, K+1)."""
    xs = [jnp.zeros((K + 1,), jnp.float32).at[0].set(1.0)]
    sum_att = att_i[:, 0:1] * xs[0]
    for j in range(1, K + 1):
        tx = calc_expansion(xs, j, alphas, paraA, paraB)
        sum_att = sum_att + att_i[:, j:j + 1] * tx
        xs.append(tx)
    return sum_att


# ---------------------------------------------------------------------------
# LSJACOBI forward (eval mode: dropout = identity, dense-adj propagation)
# ---------------------------------------------------------------------------

def lsjacobi_forward(x, adj_norm, params, *, K, nlayer, alpha, paraA, paraB,
                     out_classes):
    assert K >= 1
    N, F = x.shape
    HID = params["lin_w"][0].shape[1]
    out_dim = params["lin_w"][nlayer].shape[1]

    # Padded sizes (zero padding is exact: padded adj columns are zero, padded
    # weight columns / bias lanes are zero, and padded class lanes are masked
    # inside the log_softmax kernel). Large graphs pad to 512 so the adjacency
    # streams as 512x512 tiles; tiny graphs run as a single full-array tile.
    n_pad = _round_up(N, 512) if N > 128 else _round_up(N, 8)
    f_pad = _round_up(F, LANE)
    h_pad = _round_up(HID, LANE)
    o_pad = _round_up(out_dim, LANE)
    tile = _pick_tile(n_pad)

    xp = jnp.zeros((n_pad, f_pad), jnp.float32).at[:N, :F].set(
        x.astype(jnp.float32))
    adjp = jnp.zeros((n_pad, n_pad), jnp.float32).at[:N, :N].set(adj_norm)
    adj_bf16 = adjp.astype(jnp.bfloat16)

    alphas_vec = alpha * jnp.tanh(params["alphas"])
    alphas = [alphas_vec[i] for i in range(K + 1)]

    h = xp
    for i in range(nlayer):
        w = params["lin_w"][i]
        b = params["lin_b"][i]
        din, dout = w.shape
        din_pad = h.shape[1]
        wp = jnp.zeros((din_pad, h_pad), jnp.float32).at[:din, :dout].set(w)
        bp = jnp.zeros((1, h_pad), jnp.float32).at[:, :dout].set(b)

        sum_att = _sum_att_for_layer(params["att"][i], alphas, K, paraA, paraB)
        satt = jnp.transpose(sum_att)                       # (K+1, HID)
        sattp = jnp.zeros((K + 1, 1, h_pad), jnp.float32).at[:, 0, :HID].set(satt)

        h = layer_pallas(h, wp, bp, sattp, adj_bf16, K=K, tile=tile, h_pad=h_pad)

    # head: final linear (+ masked log_softmax), tiled over node rows
    w = params["lin_w"][nlayer]
    b = params["lin_b"][nlayer]
    wp = jnp.zeros((h_pad, o_pad), jnp.float32).at[:w.shape[0], :out_dim].set(w)
    bp = jnp.zeros((1, o_pad), jnp.float32).at[:, :out_dim].set(b)
    out = head_pallas(h, wp, bp, n_valid=out_dim,
                      log_softmax=(out_classes != 1), tile=tile)
    return out[:N, :out_dim]


# ---------------------------------------------------------------------------
# Pure-JAX reference (adj pre-rounded to bf16 to match kernel's MXU inputs)
# ---------------------------------------------------------------------------

def reference_forward(x, adj_norm, params, *, K, nlayer, alpha, paraA, paraB,
                      out_classes):
    adj = adj_norm.astype(jnp.bfloat16).astype(jnp.float32)
    alphas_vec = alpha * jnp.tanh(params["alphas"])
    alphas = [alphas_vec[i] for i in range(K + 1)]
    h = x
    for i in range(nlayer):
        h = h @ params["lin_w"][i] + params["lin_b"][i]
        sum_att = _sum_att_for_layer(params["att"][i], alphas, K, paraA, paraB)
        agg = h * sum_att[:, 0]
        cur = h
        for j in range(1, K + 1):
            cur = adj @ cur.astype(jnp.bfloat16).astype(jnp.float32)
            agg = agg + cur * sum_att[:, j]
        h = jnp.maximum(agg, 0.0)
    h = h @ params["lin_w"][nlayer] + params["lin_b"][nlayer]
    if out_classes == 1:
        return h
    return jax.nn.log_softmax(h, axis=1)


# ---------------------------------------------------------------------------
# Deterministic parameter / data construction + smoke test
# ---------------------------------------------------------------------------

def make_linear_params(key, fan_in, fan_out):
    kw, kb = jax.random.split(key)
    bound = 1.0 / math.sqrt(fan_in)
    w = jax.random.uniform(kw, (fan_in, fan_out), jnp.float32, -bound, bound)
    b = jax.random.uniform(kb, (1, fan_out), jnp.float32, -bound, bound)
    return w, b


if __name__ == "__main__":
    # small shapes implied by the module: graph with N nodes, F features
    N = 16            # num_nodes
    F = 8             # num_features
    HID = 32          # args.hidden
    K = 3             # args.K
    NLAYER = 2        # args.nlayer
    OUT = 4           # dataset.num_classes (>2 -> out_classes = 4)
    ALPHA = 1.0       # args.alpha
    PARA_A = 1.0      # args.paraA
    PARA_B = 1.0      # args.paraB

    key = jax.random.PRNGKey(0)
    keys = jax.random.split(key, NLAYER + 4)

    # node features
    x = jax.random.normal(keys[0], (N, F), jnp.float32)

    # random undirected graph with self-loops, symmetric normalization
    a = jax.random.bernoulli(keys[1], 0.3, (N, N)).astype(jnp.float32)
    a = jnp.maximum(a, a.T)
    a = jnp.maximum(a, jnp.eye(N, dtype=jnp.float32))   # add_remaining_self_loops
    deg = jnp.sum(a, axis=0)
    dinv = deg ** (-0.5)
    adj_norm = a * dinv[:, None] * dinv[None, :]

    # parameters (deterministic, mirrors __init__ shapes)
    lin_w, lin_b = [], []
    dims = [F] + [HID] * NLAYER + [OUT]
    for li in range(NLAYER + 1):
        w, b = make_linear_params(keys[2 + li], dims[li], dims[li + 1])
        lin_w.append(w)
        lin_b.append(b)

    params = {
        "lin_w": lin_w,
        "lin_b": lin_b,
        "att": jnp.ones((NLAYER, HID, K + 1), jnp.float32),
        "alphas": jnp.ones((K + 1,), jnp.float32) * float(min(1.0 / ALPHA, 1.0)),
    }

    fwd = jax.jit(functools.partial(
        lsjacobi_forward, K=K, nlayer=NLAYER, alpha=ALPHA,
        paraA=PARA_A, paraB=PARA_B, out_classes=OUT))

    out = jax.block_until_ready(fwd(x, adj_norm, params))

    ref = reference_forward(x, adj_norm, params, K=K, nlayer=NLAYER,
                            alpha=ALPHA, paraA=PARA_A, paraB=PARA_B,
                            out_classes=OUT)

    assert out.shape == (N, OUT)
    assert bool(jnp.all(jnp.isfinite(out)))
    # log_softmax rows must (log-)sum to ~1
    assert bool(jnp.allclose(jnp.sum(jnp.exp(out), axis=1), 1.0, atol=1e-4))
    # match pure-JAX reference
    assert bool(jnp.allclose(out, ref, atol=1e-2, rtol=1e-2))
    print("KERNEL_OK")
</pallas_src>

<mosaic_0001>
module attributes {stable_mosaic.version = 11 : i64} {
  func.func @_layer_kernel(%arg0: i32, %arg1: i32, %arg2: i32, %arg3: memref<16x128xf32, #tpu.memory_space<vmem>>, %arg4: memref<128x128xf32, #tpu.memory_space<vmem>>, %arg5: memref<1x128xf32, #tpu.memory_space<vmem>>, %arg6: memref<4x1x128xf32, #tpu.memory_space<vmem>>, %arg7: memref<16x16xbf16, #tpu.memory_space<vmem>>, %arg8: memref<16x128xf32, #tpu.memory_space<vmem>>, %arg9: memref<2x16x128xbf16, #tpu.memory_space<vmem>>, %arg10: memref<16x128xf32, #tpu.memory_space<vmem>>) attributes {dimension_semantics = [#tpu.dimension_semantics<arbitrary>, #tpu.dimension_semantics<arbitrary>, #tpu.dimension_semantics<arbitrary>], iteration_bounds = array<i64: 3, 1, 1>, scalar_prefetch = 0 : i64, scratch_operands = 2 : i64, tpu.core_type = #tpu.core_type<tc>, window_params = [{pipeline_mode = #tpu.pipeline_mode<synchronous>, transform_indices = @transform_0, window_bounds = array<i64: 16, 128>}, {pipeline_mode = #tpu.pipeline_mode<synchronous>, transform_indices = @transform_1, window_bounds = array<i64: 128, 128>}, {pipeline_mode = #tpu.pipeline_mode<synchronous>, transform_indices = @transform_2, window_bounds = array<i64: 1, 128>}, {pipeline_mode = #tpu.pipeline_mode<synchronous>, transform_indices = @transform_3, window_bounds = array<i64: 4, 1, 128>}, {transform_indices = @transform_4, window_bounds = array<i64: 16, 16>}, {pipeline_mode = #tpu.pipeline_mode<synchronous>, transform_indices = @transform_5, window_bounds = array<i64: 16, 128>}]} {
    %c2_i32 = arith.constant 2 : i32
    %c0_i32 = arith.constant 0 : i32
    %0 = arith.cmpi eq, %c2_i32, %c0_i32 : i32
    %c1_i32 = arith.constant 1 : i32
    %1 = arith.select %0, %c1_i32, %c2_i32 : i32
    %2 = arith.remsi %arg0, %1 : i32
    %c0_i32_0 = arith.constant 0 : i32
    %3 = arith.cmpi ne, %2, %c0_i32_0 : i32
    %c0_i32_1 = arith.constant 0 : i32
    %4 = arith.cmpi slt, %2, %c0_i32_1 : i32
    %c0_i32_2 = arith.constant 0 : i32
    %5 = arith.cmpi slt, %1, %c0_i32_2 : i32
    %6 = arith.xori %4, %5 : i1
    %7 = arith.andi %6, %3 : i1
    %8 = arith.addi %2, %1 : i32
    %9 = arith.select %7, %8, %2 : i32
    %c1_i32_3 = arith.constant 1 : i32
    %10 = arith.subi %c1_i32_3, %9 : i32
    %c16_i32 = arith.constant 16 : i32
    %11 = arith.muli %arg1, %c16_i32 : i32
    %12 = tpu.assume_multiple %11, 16 : i32
    %c16_i32_4 = arith.constant 16 : i32
    %13 = arith.muli %arg2, %c16_i32_4 : i32
    %14 = tpu.assume_multiple %13, 16 : i32
    %c0_i32_5 = arith.constant 0 : i32
    %15 = arith.cmpi eq, %arg0, %c0_i32_5 : i32
    %c0_i32_6 = arith.constant 0 : i32
    %16 = arith.cmpi eq, %arg1, %c0_i32_6 : i32
    %17 = arith.andi %15, %16 : i1
    %18 = arith.extui %17 : i1 to i32
    %c0_i32_7 = arith.constant 0 : i32
    %19 = arith.cmpi ne, %18, %c0_i32_7 : i32
    scf.if %19 {
      %40 = arith.index_cast %14 : i32 to index
      %c0_19 = arith.constant 0 : index
      %41 = vector.load %arg3[%40, %c0_19] : memref<16x128xf32, #tpu.memory_space<vmem>>, vector<16x128xf32>
      %c0_20 = arith.constant 0 : index
      %c0_21 = arith.constant 0 : index
      %42 = vector.load %arg4[%c0_20, %c0_21] : memref<128x128xf32, #tpu.memory_space<vmem>>, vector<128x128xf32>
      %cst_22 = arith.constant dense<0.000000e+00> : vector<16x128xf32>
      %43 = tpu.matmul %41, %42, %cst_22 {dimension_numbers = #tpu.dot_dimension_numbers<[1], [0], [0], [1], [0, 0, 1, 1], [], []>} : vector<16x128xf32>, vector<128x128xf32>, vector<16x128xf32> -> vector<16x128xf32>
      %c0_23 = arith.constant 0 : index
      %c0_24 = arith.constant 0 : index
      %44 = vector.load %arg5[%c0_23, %c0_24] : memref<1x128xf32, #tpu.memory_space<vmem>>, vector<1x128xf32>
      %45 = vector.broadcast %44 : vector<1x128xf32> to vector<16x128xf32>
      %46 = arith.addf %43, %45 : vector<16x128xf32>
      %47 = arith.truncf %46 : vector<16x128xf32> to vector<16x128xbf16>
      %c0_25 = arith.constant 0 : index
      %48 = arith.index_cast %14 : i32 to index
      %c0_26 = arith.constant 0 : index
      %49 = vector.load %arg9[%c0_25, %48, %c0_26] : memref<2x16x128xbf16, #tpu.memory_space<vmem>>, vector<1x16x128xbf16>
      %50 = vector.shape_cast %49 : vector<1x16x128xbf16> to vector<16x128xbf16>
      %51 = vector.shape_cast %47 : vector<16x128xbf16> to vector<1x16x128xbf16>
      tpu.vector_store %arg9[%c0_25, %48, %c0_26], %51 {strides = array<i32>} : memref<2x16x128xbf16, #tpu.memory_space<vmem>>, vector<1x16x128xbf16>,
      %c0_27 = arith.constant 0 : index
      %c0_28 = arith.constant 0 : index
      %c0_29 = arith.constant 0 : index
      %52 = vector.load %arg6[%c0_27, %c0_28, %c0_29] : memref<4x1x128xf32, #tpu.memory_space<vmem>>, vector<1x1x128xf32>
      %53 = vector.shape_cast %52 : vector<1x1x128xf32> to vector<1x128xf32>
      %54 = vector.broadcast %53 : vector<1x128xf32> to vector<16x128xf32>
      %55 = arith.mulf %46, %54 : vector<16x128xf32>
      %56 = arith.index_cast %14 : i32 to index
      %c0_30 = arith.constant 0 : index
      %57 = vector.load %arg8[%56, %c0_30] : memref<16x128xf32, #tpu.memory_space<vmem>>, vector<16x128xf32>
      tpu.vector_store %arg8[%56, %c0_30], %55 {strides = array<i32>} : memref<16x128xf32, #tpu.memory_space<vmem>>, vector<16x128xf32>,
    } else {
    }
    %c0 = arith.constant 0 : index
    %c0_8 = arith.constant 0 : index
    %20 = vector.load %arg7[%c0, %c0_8] : memref<16x16xbf16, #tpu.memory_space<vmem>>, vector<16x16xbf16>
    %21 = arith.index_cast %9 : i32 to index
    %22 = arith.index_cast %14 : i32 to index
    %c0_9 = arith.constant 0 : index
    %23 = vector.load %arg9[%21, %22, %c0_9] : memref<2x16x128xbf16, #tpu.memory_space<vmem>>, vector<1x16x128xbf16>
    %24 = vector.shape_cast %23 : vector<1x16x128xbf16> to vector<16x128xbf16>
    %cst = arith.constant dense<0.000000e+00> : vector<16x128xf32>
    %25 = tpu.matmul %20, %24, %cst {dimension_numbers = #tpu.dot_dimension_numbers<[1], [0], [0], [1], [0, 0, 1, 1], [], []>} : vector<16x16xbf16>, vector<16x128xbf16>, vector<16x128xf32> -> vector<16x128xf32>
    %c0_i32_10 = arith.constant 0 : i32
    %26 = arith.cmpi eq, %arg2, %c0_i32_10 : i32
    %27 = arith.extui %26 : i1 to i32
    %c0_i32_11 = arith.constant 0 : i32
    %28 = arith.cmpi ne, %27, %c0_i32_11 : i32
    scf.if %28 {
      %c0_19 = arith.constant 0 : index
      %c0_20 = arith.constant 0 : index
      %40 = vector.load %arg10[%c0_19, %c0_20] : memref<16x128xf32, #tpu.memory_space<vmem>>, vector<16x128xf32>
      tpu.vector_store %arg10[%c0_19, %c0_20], %25 {strides = array<i32>} : memref<16x128xf32, #tpu.memory_space<vmem>>, vector<16x128xf32>,
    } else {
    }
    %c0_i32_12 = arith.constant 0 : i32
    %29 = arith.cmpi sgt, %arg2, %c0_i32_12 : i32
    %30 = arith.extui %29 : i1 to i32
    %c0_i32_13 = arith.constant 0 : i32
    %31 = arith.cmpi ne, %30, %c0_i32_13 : i32
    scf.if %31 {
      %c0_19 = arith.constant 0 : index
      %c0_20 = arith.constant 0 : index
      %40 = vector.load %arg10[%c0_19, %c0_20] : memref<16x128xf32, #tpu.memory_space<vmem>>, vector<16x128xf32>
      %41 = arith.addf %40, %25 : vector<16x128xf32>
      %c0_21 = arith.constant 0 : index
      %c0_22 = arith.constant 0 : index
      %42 = vector.load %arg10[%c0_21, %c0_22] : memref<16x128xf32, #tpu.memory_space<vmem>>, vector<16x128xf32>
      tpu.vector_store %arg10[%c0_21, %c0_22], %41 {strides = array<i32>} : memref<16x128xf32, #tpu.memory_space<vmem>>, vector<16x128xf32>,
    } else {
    }
    %c0_i32_14 = arith.constant 0 : i32
    %32 = arith.cmpi eq, %arg2, %c0_i32_14 : i32
    %c2_i32_15 = arith.constant 2 : i32
    %33 = arith.cmpi slt, %arg0, %c2_i32_15 : i32
    %34 = arith.andi %32, %33 : i1
    %35 = arith.extui %34 : i1 to i32
    %c0_i32_16 = arith.constant 0 : i32
    %36 = arith.cmpi ne, %35, %c0_i32_16 : i32
    scf.if %36 {
      %c0_19 = arith.constant 0 : index
      %c0_20 = arith.constant 0 : index
      %40 = vector.load %arg10[%c0_19, %c0_20] : memref<16x128xf32, #tpu.memory_space<vmem>>, vector<16x128xf32>
      %41 = arith.truncf %40 : vector<16x128xf32> to vector<16x128xbf16>
      %42 = arith.index_cast %10 : i32 to index
      %43 = arith.index_cast %12 : i32 to index
      %c0_21 = arith.constant 0 : index
      %44 = vector.load %arg9[%42, %43, %c0_21] : memref<2x16x128xbf16, #tpu.memory_space<vmem>>, vector<1x16x128xbf16>
      %45 = vector.shape_cast %44 : vector<1x16x128xbf16> to vector<16x128xbf16>
      %46 = vector.shape_cast %41 : vector<16x128xbf16> to vector<1x16x128xbf16>
      tpu.vector_store %arg9[%42, %43, %c0_21], %46 {strides = array<i32>} : memref<2x16x128xbf16, #tpu.memory_space<vmem>>, vector<1x16x128xbf16>,
    } else {
    }
    %c0_i32_17 = arith.constant 0 : i32
    %37 = arith.cmpi eq, %arg2, %c0_i32_17 : i32
    %38 = arith.extui %37 : i1 to i32
    %c0_i32_18 = arith.constant 0 : i32
    %39 = arith.cmpi ne, %38, %c0_i32_18 : i32
    scf.if %39 {
      %c0_19 = arith.constant 0 : index
      %c0_20 = arith.constant 0 : index
      %40 = vector.load %arg10[%c0_19, %c0_20] : memref<16x128xf32, #tpu.memory_space<vmem>>, vector<16x128xf32>
      %41 = arith.index_cast %12 : i32 to index
      %c0_21 = arith.constant 0 : index
      %42 = vector.load %arg8[%41, %c0_21] : memref<16x128xf32, #tpu.memory_space<vmem>>, vector<16x128xf32>
      %c1_i32_22 = arith.constant 1 : i32
      %43 = arith.addi %arg0, %c1_i32_22 : i32
      %44 = arith.index_cast %43 : i32 to index
      %c0_23 = arith.constant 0 : index
      %c0_24 = arith.constant 0 : index
      %45 = vector.load %arg6[%44, %c0_23, %c0_24] : memref<4x1x128xf32, #tpu.memory_space<vmem>>, vector<1x1x128xf32>
      %46 = vector.shape_cast %45 : vector<1x1x128xf32> to vector<1x128xf32>
      %47 = vector.broadcast %46 : vector<1x128xf32> to vector<16x128xf32>
      %48 = arith.mulf %40, %47 : vector<16x128xf32>
      %49 = arith.addf %42, %48 : vector<16x128xf32>
      %c2_i32_25 = arith.constant 2 : i32
      %50 = arith.cmpi eq, %arg0, %c2_i32_25 : i32
      %cst_26 = arith.constant 0.000000e+00 : f32
      %51 = vector.broadcast %cst_26 : f32 to vector<16x128xf32>
      %52 = arith.maximumf %49, %51 : vector<16x128xf32>
      %53 = arith.select %50, %52, %49 : vector<16x128xf32>
      %54 = arith.index_cast %12 : i32 to index
      %c0_27 = arith.constant 0 : index
      %55 = vector.load %arg8[%54, %c0_27] : memref<16x128xf32, #tpu.memory_space<vmem>>, vector<16x128xf32>
      tpu.vector_store %arg8[%54, %c0_27], %53 {strides = array<i32>} : memref<16x128xf32, #tpu.memory_space<vmem>>, vector<16x128xf32>,
    } else {
    }
    return
  }
  func.func @transform_0(%arg0: i32, %arg1: i32, %arg2: i32) -> (i32, i32) {
    %c0_i32 = arith.constant 0 : i32
    %c0_i32_0 = arith.constant 0 : i32
    %c0_i32_1 = arith.constant 0 : i32
    return %c0_i32, %c0_i32_0 : i32, i32
  }
  func.func @transform_1(%arg0: i32, %arg1: i32, %arg2: i32) -> (i32, i32) {
    %c0_i32 = arith.constant 0 : i32
    %c0_i32_0 = arith.constant 0 : i32
    %c0_i32_1 = arith.constant 0 : i32
    return %c0_i32, %c0_i32_0 : i32, i32
  }
  func.func @transform_2(%arg0: i32, %arg1: i32, %arg2: i32) -> (i32, i32) {
    %c0_i32 = arith.constant 0 : i32
    %c0_i32_0 = arith.constant 0 : i32
    %c0_i32_1 = arith.constant 0 : i32
    return %c0_i32, %c0_i32_0 : i32, i32
  }
  func.func @transform_3(%arg0: i32, %arg1: i32, %arg2: i32) -> (i32, i32, i32) {
    %c0_i32 = arith.constant 0 : i32
    %c0_i32_0 = arith.constant 0 : i32
    %c0_i32_1 = arith.constant 0 : i32
    %c0_i32_2 = arith.constant 0 : i32
    return %c0_i32, %c0_i32_0, %c0_i32_1 : i32, i32, i32
  }
  func.func @transform_4(%arg0: i32, %arg1: i32, %arg2: i32) -> (i32, i32) {
    %c0_i32 = arith.constant 0 : i32
    return %arg1, %arg2 : i32, i32
  }
  func.func @transform_5(%arg0: i32, %arg1: i32, %arg2: i32) -> (i32, i32) {
    %c0_i32 = arith.constant 0 : i32
    %c0_i32_0 = arith.constant 0 : i32
    %c0_i32_1 = arith.constant 0 : i32
    return %c0_i32, %c0_i32_0 : i32, i32
  }
}

module attributes {stable_mosaic.version = 11 : i64} {
  func.func @_head_kernel(%arg0: i32, %arg1: memref<16x128xf32, #tpu.memory_space<vmem>>, %arg2: memref<128x128xf32, #tpu.memory_space<vmem>>, %arg3: memref<1x128xf32, #tpu.memory_space<vmem>>, %arg4: memref<16x128xf32, #tpu.memory_space<vmem>>) attributes {dimension_semantics = [#tpu.dimension_semantics<parallel>], iteration_bounds = array<i64: 1>, scalar_prefetch = 0 : i64, scratch_operands = 0 : i64, tpu.core_type = #tpu.core_type<tc>, window_params = [{transform_indices = @transform_0, window_bounds = array<i64: 16, 128>}, {pipeline_mode = #tpu.pipeline_mode<synchronous>, transform_indices = @transform_1, window_bounds = array<i64: 128, 128>}, {pipeline_mode = #tpu.pipeline_mode<synchronous>, transform_indices = @transform_2, window_bounds = array<i64: 1, 128>}, {transform_indices = @transform_3, window_bounds = array<i64: 16, 128>}]} {
    %c0 = arith.constant 0 : index
    %c0_0 = arith.constant 0 : index
    %0 = vector.load %arg1[%c0, %c0_0] : memref<16x128xf32, #tpu.memory_space<vmem>>, vector<16x128xf32>
    %c0_1 = arith.constant 0 : index
    %c0_2 = arith.constant 0 : index
    %1 = vector.load %arg2[%c0_1, %c0_2] : memref<128x128xf32, #tpu.memory_space<vmem>>, vector<128x128xf32>
    %cst = arith.constant dense<0.000000e+00> : vector<16x128xf32>
    %2 = tpu.matmul %0, %1, %cst {dimension_numbers = #tpu.dot_dimension_numbers<[1], [0], [0], [1], [0, 0, 1, 1], [], []>} : vector<16x128xf32>, vector<128x128xf32>, vector<16x128xf32> -> vector<16x128xf32>
    %c0_3 = arith.constant 0 : index
    %c0_4 = arith.constant 0 : index
    %3 = vector.load %arg3[%c0_3, %c0_4] : memref<1x128xf32, #tpu.memory_space<vmem>>, vector<1x128xf32>
    %4 = vector.broadcast %3 : vector<1x128xf32> to vector<16x128xf32>
    %5 = arith.addf %2, %4 : vector<16x128xf32>
    %6 = tpu.iota {dimensions = array<i32: 1>} : vector<16x128xi32>
    %c4_i32 = arith.constant 4 : i32
    %7 = vector.broadcast %c4_i32 : i32 to vector<16x128xi32>
    %8 = arith.cmpi slt, %6, %7 : vector<16x128xi32>
    %cst_5 = arith.constant -1.000000e+30 : f32
    %9 = vector.broadcast %cst_5 : f32 to vector<16x128xf32>
    %10 = arith.select %8, %5, %9 : vector<16x128xi1>, vector<16x128xf32>
    %cst_6 = arith.constant dense<0xFF800000> : vector<16xf32>
    %11 = vector.multi_reduction <maximumf>, %10, %cst_6 [1] : vector<16x128xf32> to vector<16xf32>
    %12 = vector.shape_cast %11 : vector<16xf32> to vector<16x1xf32>
    %13 = vector.broadcast %12 : vector<16x1xf32> to vector<16x128xf32>
    %14 = arith.subf %10, %13 : vector<16x128xf32>
    %15 = math.exp %14 : vector<16x128xf32>
    %cst_7 = arith.constant 0.000000e+00 : f32
    %16 = vector.broadcast %cst_7 : f32 to vector<16x128xf32>
    %17 = arith.select %8, %15, %16 : vector<16x128xi1>, vector<16x128xf32>
    %cst_8 = arith.constant dense<0.000000e+00> : vector<16xf32>
    %18 = vector.multi_reduction <add>, %17, %cst_8 [1] : vector<16x128xf32> to vector<16xf32>
    %19 = vector.shape_cast %18 : vector<16xf32> to vector<16x1xf32>
    %20 = vector.broadcast %12 : vector<16x1xf32> to vector<16x128xf32>
    %21 = arith.subf %5, %20 : vector<16x128xf32>
    %22 = math.log %19 : vector<16x1xf32>
    %23 = vector.broadcast %22 : vector<16x1xf32> to vector<16x128xf32>
    %24 = arith.subf %21, %23 : vector<16x128xf32>
    %cst_9 = arith.constant 0.000000e+00 : f32
    %25 = vector.broadcast %cst_9 : f32 to vector<16x128xf32>
    %26 = arith.select %8, %24, %25 : vector<16x128xi1>, vector<16x128xf32>
    %c0_10 = arith.constant 0 : index
    %c0_11 = arith.constant 0 : index
    %27 = vector.load %arg4[%c0_10, %c0_11] : memref<16x128xf32, #tpu.memory_space<vmem>>, vector<16x128xf32>
    tpu.vector_store %arg4[%c0_10, %c0_11], %26 {strides = array<i32>} : memref<16x128xf32, #tpu.memory_space<vmem>>, vector<16x128xf32>,
    return
  }
  func.func @transform_0(%arg0: i32) -> (i32, i32) {
    %c0_i32 = arith.constant 0 : i32
    %c0_i32_0 = arith.constant 0 : i32
    return %arg0, %c0_i32 : i32, i32
  }
  func.func @transform_1(%arg0: i32) -> (i32, i32) {
    %c0_i32 = arith.constant 0 : i32
    %c0_i32_0 = arith.constant 0 : i32
    %c0_i32_1 = arith.constant 0 : i32
    return %c0_i32, %c0_i32_0 : i32, i32
  }
  func.func @transform_2(%arg0: i32) -> (i32, i32) {
    %c0_i32 = arith.constant 0 : i32
    %c0_i32_0 = arith.constant 0 : i32
    %c0_i32_1 = arith.constant 0 : i32
    return %c0_i32, %c0_i32_0 : i32, i32
  }
  func.func @transform_3(%arg0: i32) -> (i32, i32) {
    %c0_i32 = arith.constant 0 : i32
    %c0_i32_0 = arith.constant 0 : i32
    return %arg0, %c0_i32 : i32, i32
  }
}

</mosaic_0001>

<bundles_post_ra>
// kernel: lsjacobi_forward.5
= control target key start
LH: loop header
LB: loop body
LE: loop exit
PB: predicated region body
PF: predicated region fallthrough
CT: control target
= control target key end

     0   :  { %v114_v18 = vlaneseq  ;;  %s302_s1 = inlined_call_operand.vmem [shape: f32[128,128], index: 1, kind: input, shape index: {}]   ;;  %s303_s0 = inlined_call_operand.vmem [shape: f32[16,128], index: 0, kind: input, shape index: {}]   ;;  %s304_s2 = inlined_call_operand.vmem [shape: f32[1,128], index: 2, kind: input, shape index: {}]   ;;  %s305_s3 = inlined_call_operand.vmem [shape: f32[16,128], index: 3, kind: output, shape index: {}]  }
   0x1   :  { %v31_v0 = vld [vmem:[%s302_s1 + $0x78] sm:$0xff]  ;;  %v30_v1 = vld [vmem:[%s302_s1 + $0x70] sm:$0xff]  ;;  %v29_v2 = vld [vmem:[%s302_s1 + $0x68] sm:$0xff] }
   0x2   :  { %170 = vmatprep.subr.mxu0 %v31_v0  ;;  %v28_v3 = vld [vmem:[%s302_s1 + $0x60] sm:$0xff]  ;;  %v27_v5 = vld [vmem:[%s302_s1 + $0x58] sm:$0xff]  ;;  %v26_v6 = vld [vmem:[%s302_s1 + $0x50] sm:$0xff]  ;;  %v115_v20 = vand.u32 127, %v114_v18 }
   0x3   :  { %171 = vmatpush3.msra.mxu0 %v31_v0  ;;  %v14_v4 = vld [vmem:[%s303_s0] sm:$0xff]  ;;  %v25_v7 = vld [vmem:[%s302_s1 + $0x48] sm:$0xff]  ;;  %v23_v9 = vld [vmem:[%s302_s1 + $0x38] sm:$0xff] }
   0x4   :  { %172 = vmatprep.subr.mxu0 %v30_v1  ;;  %202 = vmatprep.mubr.f32.mxu0 %v14_v4  ;;  %v24_v8 = vld [vmem:[%s302_s1 + $0x40] sm:$0xff]  ;;  %v22_v10 = vld [vmem:[%s302_s1 + $0x30] sm:$0xff]  ;;  %v21_v11 = vld [vmem:[%s302_s1 + $0x28] sm:$0xff]  ;;  %vm116_vm0 = vcmp.lt.s32.totalorder %v115_v20, 4 }
   0x5   :  { %173 = vmatpush3.msra.mxu0 %v30_v1  ;;  %v20_v12 = vld [vmem:[%s302_s1 + $0x20] sm:$0xff]  ;;  %v19_v13 = vld [vmem:[%s302_s1 + $0x18] sm:$0xff]  ;;  %v18_v14 = vld [vmem:[%s302_s1 + $0x10] sm:$0xff] }
   0x6   :  { %174 = vmatprep.subr.mxu0 %v29_v2  ;;  %v17_v15 = vld [vmem:[%s302_s1 + $0x8] sm:$0xff]  ;;  %v16_v16 = vld [vmem:[%s302_s1] sm:$0xff] }
   0x7   :  { %175 = vmatpush3.msra.mxu0 %v29_v2  ;;  %v15_v17 = vld [vmem:[%s303_s0 + $0x8] sm:$0xff]  ;;  %v151_v21 = vld [vmem:[%s304_s2] ss:$0 sm:$0xff] }
   0x8   :  { %176 = vmatprep.subr.mxu0 %v28_v3 }
   0x9   :  { %177 = vmatpush3.msra.mxu0 %v28_v3 }
   0xa   :  { %178 = vmatprep.subr.mxu0 %v27_v5 }
   0xb   :  { %179 = vmatpush3.msra.mxu0 %v27_v5 }
   0xc   :  { %180 = vmatprep.subr.mxu0 %v26_v6 }
   0xd   :  { %181 = vmatpush3.msra.mxu0 %v26_v6 }
   0xe   :  { %182 = vmatprep.subr.mxu0 %v25_v7 }
   0xf   :  { %183 = vmatpush3.msra.mxu0 %v25_v7 }
  0x10   :  { %184 = vmatprep.subr.mxu0 %v24_v8 }
  0x11   :  { %185 = vmatpush3.msra.mxu0 %v24_v8 }
  0x12   :  { %186 = vmatprep.subr.mxu0 %v23_v9 }
  0x13   :  { %187 = vmatpush3.msra.mxu0 %v23_v9 }
  0x14   :  { %188 = vmatprep.subr.mxu0 %v22_v10 }
  0x15   :  { %189 = vmatpush3.msra.mxu0 %v22_v10 }
  0x16   :  { %190 = vmatprep.subr.mxu0 %v21_v11 }
  0x17   :  { %191 = vmatpush3.msra.mxu0 %v21_v11 }
  0x18   :  { %192 = vmatprep.subr.mxu0 %v20_v12 }
  0x19   :  { %193 = vmatpush3.msra.mxu0 %v20_v12 }
  0x1a   :  { %194 = vmatprep.subr.mxu0 %v19_v13 }
  0x1b   :  { %195 = vmatpush3.msra.mxu0 %v19_v13 }
  0x1c   :  { %196 = vmatprep.subr.mxu0 %v18_v14 }
  0x1d   :  { %197 = vmatpush3.msra.mxu0 %v18_v14 }
  0x1e   :  { %198 = vmatprep.subr.mxu0 %v17_v15 }
  0x1f   :  { %199 = vmatpush3.msra.mxu0 %v17_v15 }
  0x20   :  { %200 = vmatprep.subr.mxu0 %v16_v16 }
  0x21   :  { %201 = vmatpush3.msra.mxu0 %v16_v16 }
  0x22   :  { %203 = vmatmul.mubr.f32.vlgmr.msra.gmra.mxu0 %v15_v17 }
  0xe2   :  { %v204_v19 = vpop.f32.mrf.mxu0 }
  0xe3   :  { %v111_v24 = vadd.f32 %v204_v19, %v151_v21 }
  0xe4   :  { %v105_v22 = vpop.f32.mrf.mxu0 }
  0xe5   :  { %v106_v23 = vadd.f32 %v151_v21, %v105_v22  ;;  %v118_v26 = vsel %vm116_vm0, %v111_v24, -1e+30 }
  0xe7   :  { %v117_v25 = vsel %vm116_vm0, %v106_v23, -1e+30 }
  0xe8   :  { %119 = vmax.xlane.f32.xlu0 %v117_v25 }
  0xec   :  { %121 = vmax.xlane.f32.xlu0 %v118_v26 }
 0x171   :  { %v120_v27 = vpop.xlane.xlu0 %119 }
 0x172   :  { %v123_v28 = vsub.f32 %v117_v25, %v120_v27  ;;  %v135_v40 = vsub.f32 %v106_v23, %v120_v27 }
 0x174   :  { %v125_v29 = vmul.f32 1.442695, %v123_v28 }
 0x175   :  { %v122_v30 = vpop.xlane.xlu0 %121 }
 0x176   :  { %205 = vpow2.f32 %v125_v29  ;;  %v124_v31 = vsub.f32 %v118_v26, %v122_v30  ;;  %v136_v44 = vsub.f32 %v111_v24, %v122_v30 }
 0x178   :  { %v127_v32 = vmul.f32 1.442695, %v124_v31 }
 0x17a   :  { %207 = vpow2.f32 %v127_v32 }
 0x183   :  { %v206_v33 = vpop.eup %205 }
 0x184   :  { %v129_v34 = vsel %vm116_vm0, %v206_v33, 0.0 }
 0x185   :  { %131 = vadd.xlane.f32.xlu1 %v129_v34 }
 0x187   :  { %v208_v35 = vpop.eup %207 }
 0x188   :  { %v130_v36 = vsel %vm116_vm0, %v208_v35, 0.0 }
 0x189   :  { %133 = vadd.xlane.f32.xlu1 %v130_v36 }
 0x20e   :  { %v132_v37 = vpop.xlane.xlu1 %131 }
 0x20f   :  { %209 = vlog2.f32 %v132_v37 }
 0x212   :  { %v134_v38 = vpop.xlane.xlu1 %133 }
 0x213   :  { %211 = vlog2.f32 %v134_v38 }
 0x21c   :  { %v210_v39 = vpop.eup %209 }
 0x21d   :  { %v138_v41 = vmul.f32 0.6931472, %v210_v39 }
 0x21f   :  { %v141_v42 = vsub.f32 %v135_v40, %v138_v41 }
 0x220   :  { %v212_v43 = vpop.eup %211 }
 0x221   :  { %v143_v45 = vsel %vm116_vm0, %v141_v42, 0.0  ;;  %v140_v46 = vmul.f32 0.6931472, %v212_v43 }
 0x222   :  { %145 = vst [vmem:[%s305_s3] sm:$0xff] %v143_v45 }
 0x223   :  { %v142_v47 = vsub.f32 %v136_v44, %v140_v46 }
 0x225   :  { %v144_v48 = vsel %vm116_vm0, %v142_v47, 0.0 }
 0x226   :  { %146 = vst [vmem:[%s305_s3 + $0x8] sm:$0xff] %v144_v48 }

// kernel: lsjacobi_forward.3
= control target key start
LH: loop header
LB: loop body
LE: loop exit
PB: predicated region body
PF: predicated region fallthrough
CT: control target
= control target key end

     0   :  { %s780_s18 = smov 0   ;;  %s782_s19 = smov 0   ;;  %s906_s0 = inlined_call_operand.vmem [shape: f32[16,128], index: 0, kind: input, shape index: {}]   ;;  %s907_s1 = inlined_call_operand.vmem [shape: f32[128,128], index: 1, kind: input, shape index: {}]   ;;  %s908_s2 = inlined_call_operand.vmem [shape: f32[1,128], index: 2, kind: input, shape index: {}]   ;;  %s909_s3 = inlined_call_operand.vmem [shape: f32[4,1,128], index: 3, kind: input, shape index: {}]   ;;  %s910_s4 = inlined_call_operand.vmem [shape: bf16[16,16], index: 4, kind: input, shape index: {}]   ;;  %s911_s5 = inlined_call_operand.vmem [shape: f32[16,128], index: 5, kind: output, shape index: {}]  }
   0x1   :  { %s784_s20 = smov 0  }
   0x2 LB: > { %s34_s21 = sadd.s32 1, %s742_s19  ;;  %p594_p0 = scmp.ge.s32.totalorder %s746_s20, 1  ;;  %s746_s20 = sphi %s784_s20, %s15_s20   ;;  %s742_s19 = sphi %s782_s19, %s913_s19   ;;  %s738_s18 = sphi %s780_s18, %s912_s18  }
   0x3   : > { %p36_p1 = scmp.ge.s32.totalorder %s34_s21, 3  ;;  %p207_p2 = scmp.lt.s32.totalorder %s746_s20, 4 }
   0x5   : > { %s915_s21 = smov (%p36_p1, %s34_s21), 0  ;;  %p208_p3 = pnand %p594_p0, %p207_p2 }
   0x6   : > { %p243_p4 = scmp.lt.s32.totalorder (!%p208_p3), %s738_s18, 0  ;;  %s244_s22 = ssub.s32 (!%p208_p3), 0, %s738_s18 }
   0x7   : > { %211 = sbr.rel (%p208_p3) target bundleno = 477 (0x1dd), region = 40  ;;  %s595_s23 = smin.u32 (!%p208_p3), %s738_s18, %s244_s22 }
   0x8   : > { %p258_p5 = scmp.eq.s32.totalorder (!%p208_p3), %s738_s18, 0  ;;  %s246_s24 = sand.u32 (!%p208_p3), 1, %s595_s23  }
   0x9   : > { %s247_s25 = ssub.s32 (!%p208_p3), 0, %s246_s24 }
   0xc   : > { %s917_s25 = smov (!%p243_p4, %s247_s25), %s246_s24  ;;  %263 = sbr.rel (!%p258_p5) target bundleno = 245 (0xf5), region = 44  ;;  %v282_v0 = vld [vmem:[%s907_s1 + $0x78] sm:$0xff] (%p258_p5)  ;;  %v281_v1 = vld [vmem:[%s907_s1 + $0x70] sm:$0xff] (%p258_p5)  ;;  %v280_v2 = vld [vmem:[%s907_s1 + $0x68] sm:$0xff] (%p258_p5) }
   0xd   : > { %p597_p6 = scmp.lt.s32.totalorder %s917_s25, 0  ;;  %s253_s26 = sadd.s32 2, %s917_s25  ;;  %655 = vmatprep.subr.mxu0 (%p258_p5), %v282_v0  ;;  %v279_v3 = vld [vmem:[%s907_s1 + $0x60] sm:$0xff] (%p258_p5)  ;;  %v278_v5 = vld [vmem:[%s907_s1 + $0x58] sm:$0xff] (%p258_p5)  ;;  %v277_v6 = vld [vmem:[%s907_s1 + $0x50] sm:$0xff] (%p258_p5) }
   0xe   : > { %656 = vmatpush3.msra.mxu0 (%p258_p5), %v282_v0  ;;  %v265_v4 = vld [vmem:[%s906_s0] sm:$0xff] (%p258_p5)  ;;  %v276_v7 = vld [vmem:[%s907_s1 + $0x48] sm:$0xff] (%p258_p5)  ;;  %v274_v9 = vld [vmem:[%s907_s1 + $0x38] sm:$0xff] (%p258_p5) }
   0xf   : > { %s919_s26 = smov (!%p597_p6, %s253_s26), %s917_s25  ;;  %657 = vmatprep.subr.mxu0 (%p258_p5), %v281_v1  ;;  %687 = vmatprep.mubr.f32.mxu0 (%p258_p5), %v265_v4  ;;  %v275_v8 = vld [vmem:[%s907_s1 + $0x40] sm:$0xff] (%p258_p5)  ;;  %v273_v10 = vld [vmem:[%s907_s1 + $0x30] sm:$0xff] (%p258_p5)  ;;  %v272_v11 = vld [vmem:[%s907_s1 + $0x28] sm:$0xff] (%p258_p5) }
  0x10   : > { %s255_s27 = ssub.s32 1, %s919_s26  ;;  %658 = vmatpush3.msra.mxu0 (%p258_p5), %v281_v1  ;;  %v271_v12 = vld [vmem:[%s907_s1 + $0x20] sm:$0xff] (%p258_p5)  ;;  %v270_v13 = vld [vmem:[%s907_s1 + $0x18] sm:$0xff] (%p258_p5)  ;;  %v269_v14 = vld [vmem:[%s907_s1 + $0x10] sm:$0xff] (%p258_p5) }
  0x11   : > { %659 = vmatprep.subr.mxu0 %v280_v2  ;;  %v268_v15 = vld [vmem:[%s907_s1 + $0x8] sm:$0xff]  ;;  %v267_v16 = vld [vmem:[%s907_s1] sm:$0xff] }
  0x12   : > { %660 = vmatpush3.msra.mxu0 %v280_v2  ;;  %v266_v17 = vld [vmem:[%s906_s0 + $0x8] sm:$0xff]  ;;  %v599_v18 = vld [vmem:[%s908_s2] ss:$0 sm:$0xff] }
  0x13   : > { %661 = vmatprep.subr.mxu0 %v279_v3  ;;  %v602_v20 = vld [vmem:[%s909_s3] ss:$0 sm:$0xff] }
  0x14   : > { %662 = vmatpush3.msra.mxu0 %v279_v3 }
  0x15   : > { %663 = vmatprep.subr.mxu0 %v278_v5 }
  0x16   : > { %664 = vmatpush3.msra.mxu0 %v278_v5 }
  0x17   : > { %665 = vmatprep.subr.mxu0 %v277_v6 }
  0x18   : > { %666 = vmatpush3.msra.mxu0 %v277_v6 }
  0x19   : > { %667 = vmatprep.subr.mxu0 %v276_v7 }
  0x1a   : > { %668 = vmatpush3.msra.mxu0 %v276_v7 }
  0x1b   : > { %669 = vmatprep.subr.mxu0 %v275_v8 }
  0x1c   : > { %670 = vmatpush3.msra.mxu0 %v275_v8 }
  0x1d   : > { %671 = vmatprep.subr.mxu0 %v274_v9 }
  0x1e   : > { %672 = vmatpush3.msra.mxu0 %v274_v9 }
  0x1f   : > { %673 = vmatprep.subr.mxu0 %v273_v10 }
  0x20   : > { %674 = vmatpush3.msra.mxu0 %v273_v10 }
  0x21   : > { %675 = vmatprep.subr.mxu0 %v272_v11 }
  0x22   : > { %676 = vmatpush3.msra.mxu0 %v272_v11 }
  0x23   : > { %677 = vmatprep.subr.mxu0 %v271_v12 }
  0x24   : > { %678 = vmatpush3.msra.mxu0 %v271_v12 }
  0x25   : > { %679 = vmatprep.subr.mxu0 %v270_v13 }
  0x26   : > { %680 = vmatpush3.msra.mxu0 %v270_v13 }
  0x27   : > { %681 = vmatprep.subr.mxu0 %v269_v14 }
  0x28   : > { %682 = vmatpush3.msra.mxu0 %v269_v14 }
  0x29   : > { %683 = vmatprep.subr.mxu0 %v268_v15 }
  0x2a   : > { %684 = vmatpush3.msra.mxu0 %v268_v15 }
  0x2b   : > { %685 = vmatprep.subr.mxu0 %v267_v16 }
  0x2c   : > { %686 = vmatpush3.msra.mxu0 %v267_v16 }
  0x2d   : > { %688 = vmatmul.mubr.f32.vlgmr.msra.gmra.mxu0 %v266_v17 }
  0xed   : > { %v689_v19 = vpop.f32.mrf.mxu0 }
  0xee   : > { %v362_v21 = vadd.f32 %v689_v19, %v599_v18 }
  0xef   : > { %v356_v22 = vpop.f32.mrf.mxu0 }
  0xf0   : > { %v387_v23 = vmul.f32 %v602_v20, %v362_v21  ;;  %v357_v24 = vadd.f32 %v599_v18, %v356_v22 }
  0xf2   : > { %390 = vst [vmem:[%s911_s5 + $0x8] sm:$0xff] %v387_v23  ;;  %v628_v25 = vpack.c.bf16 %v362_v21, %v357_v24  ;;  %v386_v26 = vmul.f32 %v602_v20, %v357_v24 }
  0xf4   : > { %629 = vst [vmem:[#allocation2] sm:$0xff] %v628_v25   ;;  %389 = vst [vmem:[%s911_s5] sm:$0xff] %v386_v26 }
  0xf5 PF: > { %s620_s9 = sshll.u32 %s919_s26, 3  ;;  %v748_v27 = vmov 0.0   ;;  %vm749_vm0 = vmmov 0   ;;  %v723_v29 = vld [vmem:[%s910_s4] sm:$0xff]   ;;  %vm412_vm1 = vcmask 130048   ;;  %p473_p7 = scmp.lt.s32.totalorder %s738_s18, 2 }
  0xf6   : > { %690 = vmatprep.subr.bf16.mxu0 %v748_v27  ;;  %692 = vmatprep.mubr.msk.bf16.mxu0 %vm749_vm0, %v748_v27  ;;  %s398_s10 = scalar_lea.vmem [#allocation2], %s620_s9  ;;  %s624_s13 = sshll.u32 (%p473_p7), %s255_s27, 3 }
  0xf7   : > { %s493_s14 = scalar_lea.vmem (%p473_p7), [#allocation2], %s624_s13 }
  0xfb   : > { %v722_v28 = vld [vmem:[%s398_s10] sm:$0xff]  }
  0xfc   : > { %691 = vmatpush3.bf16.msra.mxu0 %v722_v28 }
  0xff   : > { %693 = vmatmul.mubr.msk.bf16.vlgmr.msra.gmra.mxu0 %vm412_vm1, %v723_v29 }
 0x1bf   : > { %v450_v30 = vpop.f32.mrf.mxu0 }
 0x1c0   : > { %461 = vst [vmem:[#allocation3] sm:$0xff] %v450_v30 }
 0x1c1   : > { %v694_v31 = vpop.f32.mrf.mxu0  ;;  %477 = sbr.rel (!%p473_p7) target bundleno = 463 (0x1cf), region = 56 }
 0x1c3   : > { %v453_v32 = vpop.f32.mrf.mxu0 }
 0x1c4   : > { %462 = vst [vmem:[#allocation3 + $0x8] sm:$0xff] %v453_v32 }
 0x1c5   : > { %v695_v33 = vpop.f32.mrf.mxu0 }
 0x1c7   : > { %v478_v34 = vld [vmem:[#allocation3] sm:$0xff] }
 0x1cb   : > { %v479_v35 = vld [vmem:[#allocation3 + $0x8] sm:$0xff] }
 0x1cc   : > { %v633_v36 = vpack.c.bf16 %v479_v35, %v478_v34 }
 0x1ce   : > { %634 = vst [vmem:[%s493_s14] sm:$0xff] %v633_v36  }
 0x1cf PF: > { %s563_s17 = scalar_lea.vmem %s909_s3, %s738_s18  ;;  %p517_p8 = scmp.eq.s32.totalorder %s738_s18, 2  ;;  %v502_v39 = vld [vmem:[%s911_s5] sm:$0xff]  ;;  %v503_v41 = vld [vmem:[%s911_s5 + $0x8] sm:$0xff] }
 0x1d0   : > { %v499_v37 = vld [vmem:[#allocation3] sm:$0xff]  ;;  %v614_v40 = vld [vmem:[%s563_s17 + $0x1] ss:$0 sm:$0xff] }
 0x1d1   : > { %v513_v42 = vmul.f32 %v614_v40, %v499_v37  ;;  %s520_s24 = scalar_select %p517_p8, 1, 0 }
 0x1d3   : > { %v515_v44 = vadd.f32 %v513_v42, %v502_v39  ;;  %v521_v45 = vstv %s520_s24 }
 0x1d4   : > { %v500_v38 = vld [vmem:[#allocation3 + $0x8] sm:$0xff]  ;;  %vm522_vm2 = vcmp.eq.s32.totalorder %v521_v45, 1 }
 0x1d5   : > { %v514_v43 = vmul.f32 %v614_v40, %v500_v38  ;;  %v518_v47 = vmax.f32 %v515_v44, 0.0 }
 0x1d7   : > { %v516_v46 = vadd.f32 %v514_v43, %v503_v41  ;;  %v523_v49 = vsel %vm522_vm2, %v518_v47, %v515_v44 }
 0x1d8   : > { %525 = vst [vmem:[%s911_s5] sm:$0xff] %v523_v49 }
 0x1d9   : > { %v519_v48 = vmax.f32 %v516_v46, 0.0 }
 0x1db   : > { %v524_v50 = vsel %vm522_vm2, %v519_v48, %v516_v46 }
 0x1dc   : > { %526 = vst [vmem:[%s911_s5 + $0x8] sm:$0xff] %v524_v50 }
 0x1dd PF: > { %s15_s20 = sadd.s32 1, %s746_s20   ;;  %s912_s18 = smov %s742_s19 }
 0x1de   : > { %p12_p9 = scmp.ge.s32.totalorder %s15_s20, 5   ;;  %s913_s19 = smov %s915_s21 }
 0x1e0   :  { %14 = sbr.rel (!%p12_p9) target bundleno = 2 (0x2), region = 93 }

</bundles_post_ra>
